<compile_context>
chip_gen: v5e
topology: v5e:2x2
jax: 0.10.0
libtpu: 0.0.40
codegen_flags: <defaults>
</compile_context>

<pallas_src>
import functools

import jax
import jax.numpy as jnp
from jax.experimental import pallas as pl
from jax.experimental.pallas import tpu as pltpu

_NEG_SLOPE = 0.01            # nn.LeakyReLU() default
_LANE = 128
_SUBLANE = 8
_W_RESIDENT_MAX_ROWS = 2048  # ~1 MiB lane-padded VMEM for the resident column


def _round_up(n, m):
    return -(-n // m) * m


def _vmem_capacity_bytes():
    try:
        cap = int(pltpu.get_tpu_info().vmem_capacity_bytes)
        if cap > 0:
            return cap
    except Exception:
        pass
    return 64 * 1024 * 1024  # conservative fallback: v7x per-TC VMEM


def _compiler_params(working_set_bytes, vmem_cap, semantics):
    # Derive the scoped-VMEM cap from the actual working set (+slack) and keep
    # it under 3/4 of physical VMEM (48 MiB on v7x, 96 MiB on v5e/v6e).
    limit = int(working_set_bytes) + (4 << 20)
    limit = max(limit, 16 << 20)
    limit = min(limit, (vmem_cap * 3) // 4)
    return pltpu.CompilerParams(dimension_semantics=semantics,
                                vmem_limit_bytes=limit)


def _pad2d(a, n_rows, n_cols):
    r, c = a.shape
    if r == n_rows and c == n_cols:
        return a
    return jnp.pad(a, ((0, n_rows - r), (0, n_cols - c)))


# ----------------------------- kernels ------------------------------------


def _gate_scale_kernel(x_ref, w_ref, o_ref, *, tr, w_resident):
    """Fast path: mean (via sum), gate, LeakyReLU, scale -- one pass."""
    xf = x_ref[...].astype(jnp.float32)                    # (tr, S)
    if w_resident:
        r0 = pl.multiple_of(pl.program_id(0) * tr, _SUBLANE)
        w = w_ref[pl.ds(r0, tr), :]                        # (tr, 1)
    else:
        w = w_ref[...]                                     # (tr, 1)
    row_sum = jnp.sum(xf, axis=-1, keepdims=True)          # lane reduction
    gate = row_sum * w                                     # w holds tap * (1/S)
    gate = jnp.where(gate >= 0, gate, _NEG_SLOPE * gate)   # LeakyReLU
    o_ref[...] = (xf * gate).astype(o_ref.dtype)


def _gate_reduce_kernel(x_ref, w_ref, g_ref, acc_ref):
    """Fallback pass A: accumulate per-row sum over S tiles, emit gate."""
    j = pl.program_id(1)

    @pl.when(j == 0)
    def _():
        acc_ref[...] = jnp.zeros_like(acc_ref)

    acc_ref[...] += jnp.sum(x_ref[...].astype(jnp.float32), axis=-1,
                            keepdims=True)

    @pl.when(j == pl.num_programs(1) - 1)
    def _():
        gate = acc_ref[...] * w_ref[...]
        g_ref[...] = jnp.where(gate >= 0, gate, _NEG_SLOPE * gate)


def _apply_gate_kernel(x_ref, g_ref, o_ref):
    """Fallback pass B: scale x by the precomputed per-row gate."""
    o_ref[...] = (x_ref[...].astype(jnp.float32) * g_ref[...]).astype(o_ref.dtype)


# ----------------------------- wrapper ------------------------------------


def channel_gate2(x, conv_weight, k_size, *, vmem_budget_bytes=None):
    """x: (B, C, D, H, W); conv_weight: (C, 1, K) (PyTorch Conv1d layout)."""
    b, c, d, h, w = x.shape
    s = d * h * w
    rows = b * c
    center = (k_size - 1) // 2
    itemsize = jnp.dtype(x.dtype).itemsize

    vmem_cap = _vmem_capacity_bytes()
    if vmem_budget_bytes is None:
        # Double-buffered in+out working set <= 3/8 of physical VMEM:
        # 24 MiB on v7x (64 MiB), 48 MiB on v5e/v6e (128 MiB).
        budget = min(48 << 20, (vmem_cap * 3) // 8)
    else:
        budget = int(vmem_budget_bytes)

    # Per-(batch, channel) scale = center tap of that channel's depthwise
    # kernel with the true 1/S folded in (so zero padding never skews the mean).
    w_center = conv_weight[:, 0, center].astype(jnp.float32) * (1.0 / s)
    w_col = jnp.tile(w_center, b).reshape(rows, 1)          # (B*C, 1)

    s_pad = _round_up(s, _LANE)                             # lane-dense spatial axis
    x2d = x.reshape(rows, s)

    per_row = 4 * s_pad * itemsize                          # 2 bufs * (in + out) / row
    max_tr = (budget // per_row) // _SUBLANE * _SUBLANE

    if max_tr >= _SUBLANE:
        # ---------------- fast path: single pass, 1-D row grid ----------------
        tr = max_tr
        rows8 = _round_up(rows, _SUBLANE)
        if rows >= 16:
            # Force >= 2 (>= 4 for bigger problems) grid steps so the
            # "parallel" row axis can shard across v7x's two TensorCores.
            target_steps = 4 if rows >= 64 else 2
            tr = min(tr, max(_SUBLANE,
                             (rows // target_steps) // _SUBLANE * _SUBLANE))
        tr = min(tr, rows8)
        rows_pad = _round_up(rows, tr)
        grid = (rows_pad // tr,)

        x2d_p = _pad2d(x2d, rows_pad, s_pad)
        w_p = _pad2d(w_col, rows_pad, 1)

        w_resident = rows_pad <= _W_RESIDENT_MAX_ROWS
        if w_resident:
            w_spec = pl.BlockSpec((rows_pad, 1), lambda i: (0, 0))
            w_bytes = 2 * rows_pad * _LANE * 4
        else:
            w_spec = pl.BlockSpec((tr, 1), lambda i: (i, 0))
            w_bytes = 2 * tr * _LANE * 4

        working_set = 4 * tr * s_pad * itemsize + w_bytes
        out2d = pl.pallas_call(
            functools.partial(_gate_scale_kernel, tr=tr, w_resident=w_resident),
            out_shape=jax.ShapeDtypeStruct((rows_pad, s_pad), x.dtype),
            grid=grid,
            in_specs=[pl.BlockSpec((tr, s_pad), lambda i: (i, 0)), w_spec],
            out_specs=pl.BlockSpec((tr, s_pad), lambda i: (i, 0)),
            compiler_params=_compiler_params(working_set, vmem_cap, ("parallel",)),
            cost_estimate=pl.CostEstimate(
                flops=3 * rows * s, transcendentals=0,
                bytes_accessed=2 * rows * s * itemsize + rows * 4),
        )(x2d_p, w_p)
    else:
        # -------- fallback: huge S -- tile the lane axis too (two passes) -----
        tr = _SUBLANE
        ts = max(_LANE, (budget // (4 * tr * itemsize)) // _LANE * _LANE)
        ts = min(ts, s_pad)
        s_pad = _round_up(s_pad, ts)                        # exact S-block coverage
        rows_pad = _round_up(rows, tr)
        grid = (rows_pad // tr, s_pad // ts)

        x2d_p = _pad2d(x2d, rows_pad, s_pad)
        w_p = _pad2d(w_col, rows_pad, 1)

        # Pass A: per-row sum -> gate (reduction axis last, "arbitrary").
        gate = pl.pallas_call(
            _gate_reduce_kernel,
            out_shape=jax.ShapeDtypeStruct((rows_pad, 1), jnp.float32),
            grid=grid,
            in_specs=[pl.BlockSpec((tr, ts), lambda i, j: (i, j)),
                      pl.BlockSpec((tr, 1), lambda i, j: (i, 0))],
            out_specs=pl.BlockSpec((tr, 1), lambda i, j: (i, 0)),
            scratch_shapes=[pltpu.VMEM((tr, 1), jnp.float32)],
            compiler_params=_compiler_params(
                2 * tr * ts * itemsize + 4 * tr * _LANE * 4,
                vmem_cap, ("parallel", "arbitrary")),
            cost_estimate=pl.CostEstimate(
                flops=2 * rows * s, transcendentals=0,
                bytes_accessed=rows * s * itemsize + rows * 4),
        )(x2d_p, w_p)

        # Pass B: stream x again and apply the gate (fully parallel grid).
        out2d = pl.pallas_call(
            _apply_gate_kernel,
            out_shape=jax.ShapeDtypeStruct((rows_pad, s_pad), x.dtype),
            grid=grid,
            in_specs=[pl.BlockSpec((tr, ts), lambda i, j: (i, j)),
                      pl.BlockSpec((tr, 1), lambda i, j: (i, 0))],
            out_specs=pl.BlockSpec((tr, ts), lambda i, j: (i, j)),
            compiler_params=_compiler_params(
                4 * tr * ts * itemsize + 4 * tr * _LANE * 4,
                vmem_cap, ("parallel", "parallel")),
            cost_estimate=pl.CostEstimate(
                flops=rows * s, transcendentals=0,
                bytes_accessed=2 * rows * s * itemsize + rows * 4),
        )(x2d_p, gate)

    if rows_pad != rows or s_pad != s:
        out2d = out2d[:rows, :s]
    return out2d.reshape(b, c, d, h, w)


def channel_gate2_ref(x, conv_weight, k_size):
    """Pure-JAX reference matching the PyTorch forward."""
    center = (k_size - 1) // 2
    y = jnp.mean(x, axis=(2, 3, 4))                         # (B, C)
    y = y * conv_weight[:, 0, center][None, :]              # depthwise conv, len-1 input
    y = jnp.where(y >= 0, y, _NEG_SLOPE * y)                # LeakyReLU
    return x * y[:, :, None, None, None]


if __name__ == "__main__":
    key = jax.random.PRNGKey(0)
    kx, kw, k2, k3 = jax.random.split(key, 4)

    B, C, D, H, W = 2, 4, 8, 8, 8
    K_SIZE = 3
    x = jax.random.normal(kx, (B, C, D, H, W), dtype=jnp.float32)
    conv_w = jax.random.normal(kw, (C, 1, K_SIZE), dtype=jnp.float32) * 0.5

    # 1) Fast path, single grid step (rows = 8).
    out = jax.block_until_ready(channel_gate2(x, conv_w, K_SIZE))
    ref = channel_gate2_ref(x, conv_w, K_SIZE)
    assert out.shape == x.shape
    assert jnp.allclose(out, ref, atol=1e-5, rtol=1e-5), "mismatch (fast path)"

    # 2) Fast path with forced multi-step "parallel" row grid (rows = 16).
    x2 = jax.random.normal(k2, (4, C, D, H, W), dtype=jnp.float32)
    out2 = jax.block_until_ready(channel_gate2(x2, conv_w, K_SIZE))
    ref2 = channel_gate2_ref(x2, conv_w, K_SIZE)
    assert jnp.allclose(out2, ref2, atol=1e-5, rtol=1e-5), "mismatch (tiled rows)"

    # 3) S-tiled two-pass fallback, forced via a tiny VMEM budget override.
    out3 = jax.block_until_ready(
        channel_gate2(x2, conv_w, K_SIZE, vmem_budget_bytes=32 * 1024))
    assert jnp.allclose(out3, ref2, atol=1e-5, rtol=1e-5), "mismatch (S-tiled fallback)"

    # 4) Lane-padding path: S = 4*4*4 = 64 (< 128) and rows = 15 (not mult of 8).
    x4 = jax.random.normal(k3, (3, 5, 4, 4, 4), dtype=jnp.float32)
    conv_w5 = jax.random.normal(kw, (5, 1, K_SIZE), dtype=jnp.float32) * 0.5
    out4 = jax.block_until_ready(channel_gate2(x4, conv_w5, K_SIZE))
    ref4 = channel_gate2_ref(x4, conv_w5, K_SIZE)
    assert jnp.allclose(out4, ref4, atol=1e-5, rtol=1e-5), "mismatch (lane-padded)"

    print("KERNEL_OK")
</pallas_src>

<mosaic_0001>
module attributes {stable_mosaic.version = 11 : i64} {
  func.func @_gate_scale_kernel(%arg0: i32, %arg1: memref<8x512xf32, #tpu.memory_space<vmem>>, %arg2: memref<8x1xf32, #tpu.memory_space<vmem>>, %arg3: memref<8x512xf32, #tpu.memory_space<vmem>>) attributes {dimension_semantics = [#tpu.dimension_semantics<parallel>], iteration_bounds = array<i64: 1>, scalar_prefetch = 0 : i64, scratch_operands = 0 : i64, tpu.core_type = #tpu.core_type<tc>, window_params = [{transform_indices = @transform_0, window_bounds = array<i64: 8, 512>}, {pipeline_mode = #tpu.pipeline_mode<synchronous>, transform_indices = @transform_1, window_bounds = array<i64: 8, 1>}, {transform_indices = @transform_2, window_bounds = array<i64: 8, 512>}]} {
    %c0 = arith.constant 0 : index
    %c0_0 = arith.constant 0 : index
    %0 = vector.load %arg1[%c0, %c0_0] : memref<8x512xf32, #tpu.memory_space<vmem>>, vector<8x512xf32>
    %c8_i32 = arith.constant 8 : i32
    %1 = arith.muli %arg0, %c8_i32 : i32
    %2 = tpu.assume_multiple %1, 8 : i32
    %3 = arith.index_cast %2 : i32 to index
    %c0_1 = arith.constant 0 : index
    %4 = vector.load %arg2[%3, %c0_1] : memref<8x1xf32, #tpu.memory_space<vmem>>, vector<8x1xf32>
    %cst = arith.constant dense<0.000000e+00> : vector<8xf32>
    %5 = vector.multi_reduction <add>, %0, %cst [1] : vector<8x512xf32> to vector<8xf32>
    %6 = vector.shape_cast %5 : vector<8xf32> to vector<8x1xf32>
    %7 = arith.mulf %6, %4 : vector<8x1xf32>
    %cst_2 = arith.constant 0.000000e+00 : f32
    %8 = vector.broadcast %cst_2 : f32 to vector<8x1xf32>
    %9 = arith.cmpf oge, %7, %8 : vector<8x1xf32>
    %cst_3 = arith.constant 0.00999999977 : f32
    %10 = vector.broadcast %cst_3 : f32 to vector<8x1xf32>
    %11 = arith.mulf %10, %7 : vector<8x1xf32>
    %12 = arith.select %9, %7, %11 : vector<8x1xi1>, vector<8x1xf32>
    %13 = vector.broadcast %12 : vector<8x1xf32> to vector<8x512xf32>
    %14 = arith.mulf %0, %13 : vector<8x512xf32>
    %c0_4 = arith.constant 0 : index
    %c0_5 = arith.constant 0 : index
    %15 = vector.load %arg3[%c0_4, %c0_5] : memref<8x512xf32, #tpu.memory_space<vmem>>, vector<8x512xf32>
    tpu.vector_store %arg3[%c0_4, %c0_5], %14 {strides = array<i32>} : memref<8x512xf32, #tpu.memory_space<vmem>>, vector<8x512xf32>,
    return
  }
  func.func @transform_0(%arg0: i32) -> (i32, i32) {
    %c0_i32 = arith.constant 0 : i32
    %c0_i32_0 = arith.constant 0 : i32
    return %arg0, %c0_i32 : i32, i32
  }
  func.func @transform_1(%arg0: i32) -> (i32, i32) {
    %c0_i32 = arith.constant 0 : i32
    %c0_i32_0 = arith.constant 0 : i32
    %c0_i32_1 = arith.constant 0 : i32
    return %c0_i32, %c0_i32_0 : i32, i32
  }
  func.func @transform_2(%arg0: i32) -> (i32, i32) {
    %c0_i32 = arith.constant 0 : i32
    %c0_i32_0 = arith.constant 0 : i32
    return %arg0, %c0_i32 : i32, i32
  }
}

</mosaic_0001>

<bundles_post_ra>
// kernel: tpu_custom_call.1
= control target key start
LH: loop header
LB: loop body
LE: loop exit
PB: predicated region body
PF: predicated region fallthrough
CT: control target
= control target key end

     0   :  { %7 = vsyncpa [#allocation3], 0  ;;  %s155_s0 = inlined_call_operand.hbm [shape: f32[8,512], index: 0, kind: input, shape index: {}]   ;;  %s156_s1 = inlined_call_operand.vmem [shape: f32[8,1], index: 1, kind: input, shape index: {}]   ;;  %s157_s2 = inlined_call_operand.hbm [shape: f32[8,512], index: 2, kind: output, shape index: {}]  }
   0x1   :  { %8 = vsyncpa [#allocation4], 0  ;;  %s14_s11 = sshll.u32 %s155_s0, 4  ;;  %s128_s12 = smov [#allocation2]   ;;  %s15_s11 = int_to_ptr.hbm [resolvable:$true] %s14_s11 }
   0x2   :  { %s16_s13 = sshll.u32 %s128_s12, 4  ;;  %s17_s13 = int_to_ptr.vmem [resolvable:$true] %s16_s13 }
   0x3   :  { %19 = dma.hbm_to_vmem [thread:$0]  %s15_s11, 512, %s17_s13, [#allocation3]  }
   0x4   :  { %124 = dma.done.wait [#allocation3], 512  }
   0x5   :  { %125 = vsyncadd [#allocation3], 4294966784  ;;  %v26_v0 = vld [vmem:[#allocation2] sm:$0xff]  ;;  %v27_v1 = vld [vmem:[#allocation2 + $0x8] sm:$0xff]  ;;  %v129_v7 = vmov 0   ;;  %s130_s0 = smov [#allocation5]  }
   0x6   :  { %v28_v2 = vld [vmem:[#allocation2 + $0x10] sm:$0xff]  ;;  %v33_v3 = vadd.f32 %v27_v1, %v26_v0  ;;  %v29_v4 = vld [vmem:[#allocation2 + $0x18] sm:$0xff]  ;;  %75 = vset.pattern.permute.xlu0 %v129_v7  ;;  %v32_v8 = vld [vmem:[%s156_s1] sm:$0xff]  ;;  %s60_s16 = sshll.u32 %s130_s0, 4  ;;  %s62_s19 = sshll.u32 %s157_s2, 4  ;;  %s61_s16 = int_to_ptr.vmem [resolvable:$true] %s60_s16  ;;  %s63_s19 = int_to_ptr.hbm [resolvable:$true] %s62_s19 }
   0x8   :  { %v34_v5 = vadd.f32 %v33_v3, %v28_v2 }
   0xa   :  { %v35_v6 = vadd.f32 %v34_v5, %v29_v4 }
   0xc   :  { %36 = vadd.xlane.f32.xlu0 %v35_v6 }
  0x7f   :  { %v37_v9 = vpop.xlane.xlu0 %36 }
  0x80   :  { %v38_v10 = vmul.f32 %v37_v9, %v32_v8 }
  0x82   :  { %v40_v11 = vmul.f32 0.01, %v38_v10  ;;  %vm39_vm0 = vcmp.ge.f32.partialorder %v38_v10, 0.0 }
  0x84   :  { %v41_v12 = vsel %vm39_vm0, %v38_v10, %v40_v11 }
  0x85   :  { %44 = vperm.xlu0 %75, %v41_v12  }
  0xf7   :  { %v45_v13 = vpop.permute.xlu0 %44 }
  0xf8   :  { %v47_v14 = vmul.f32 %v45_v13, %v26_v0  ;;  %v48_v15 = vmul.f32 %v45_v13, %v27_v1  ;;  %v49_v16 = vmul.f32 %v45_v13, %v28_v2  ;;  %v50_v17 = vmul.f32 %v45_v13, %v29_v4 }
  0xfa   :  { %51 = vst [vmem:[#allocation5] sm:$0xff] %v47_v14 }
  0xfb   :  { %52 = vst [vmem:[#allocation5 + $0x8] sm:$0xff] %v48_v15 }
  0xfc   :  { %53 = vst [vmem:[#allocation5 + $0x10] sm:$0xff] %v49_v16 }
  0xfd   :  { %54 = vst [vmem:[#allocation5 + $0x18] sm:$0xff] %v50_v17 }
  0xfe   :  { %65 = dma.vmem_to_hbm [thread:$0]  %s61_s16, 512, %s63_s19, [#allocation4]  }
  0xff   :  { %126 = dma.done.wait [#allocation4], 512  }
 0x100   :  { %127 = vsyncadd [#allocation4], 4294966784 }
 0x101   :  { %70 = vsyncpa [#allocation3], 1 }
 0x102   :  { %71 = vsyncpa [#allocation4], 1 }

</bundles_post_ra>
